<compile_context>
chip_gen: v6e
topology: v6e:2x2x1
jax: 0.10.0
libtpu: 0.0.40
codegen_flags: <defaults>
</compile_context>

<pallas_src>
import functools

import jax
import jax.numpy as jnp
from jax import lax
from jax.experimental import pallas as pl
from jax.experimental.pallas import tpu as pltpu


def _round_up(x, m):
    return (x + m - 1) // m * m


def _choose_tile_n(n, d, itemsize, target_stream_bytes=8 << 20, max_tile=4096):
    """Largest multiple-of-128 tile whose double-buffered feature stream fits budget."""
    lane_d = max(_round_up(d, 128), 128)          # lane dim pads to 128 in VMEM
    tile = max_tile
    while tile > 128 and 2 * tile * lane_d * itemsize > target_stream_bytes:
        tile //= 2
    return min(tile, max(128, _round_up(n, 128)))  # no point tiling far beyond the bag


def _vmem_limit_bytes(tile_n, d, mid, feat_itemsize):
    """Rough scoped-VMEM budget: stream + resident weights + outputs + headroom."""
    lane_d = max(_round_up(d, 128), 128)
    lane_mid = max(_round_up(mid, 128), 128)
    stream = 2 * tile_n * lane_d * feat_itemsize                        # double-buffered tiles
    weights = 2 * (_round_up(d, 8) * lane_mid * feat_itemsize + 3 * 8 * lane_mid * 4)
    outs = 2 * (8 * tile_n * 4 + 8 * lane_d * 4)                        # out2 + partial blocks
    interm = tile_n * (lane_mid + 2 * lane_d) * 4 + (8 << 20)           # h / masked feats + slack
    return int(min(max(stream + weights + outs + interm, 32 << 20), 64 << 20))


def _abmil_kernel(n_ref, feat_ref, w1_ref, b1_ref, w2t_ref, b2_ref,
                  partial_ref, out2_ref, *, tile_n, tiles_per_slice):
    s = pl.program_id(0)   # bag slice ("parallel": sharded across TCs on v7x)
    t = pl.program_id(1)   # tile within slice ("arbitrary": carries the accumulator)

    @pl.when(t == 0)
    def _init():
        partial_ref[...] = jnp.zeros_like(partial_ref)   # per-slice pooled accumulator

    n = n_ref[0]                                   # bag size from SMEM (scalar prefetch)
    inv_n = 1.0 / n.astype(jnp.float32)
    row0 = (s * tiles_per_slice + t) * tile_n      # logical row offset (unclamped)

    # Zero rows past the end of the bag: the ragged last tile (and clamped duplicate
    # tiles) contains unspecified data which must not reach the matmuls (0*NaN = NaN).
    valid_col = (row0 + lax.broadcasted_iota(jnp.int32, (tile_n, 1), 0)) < n
    feats = jnp.where(valid_col, feat_ref[...], 0)                          # (TILE_N, D)

    # Attention MLP: Linear(D, mid) on the MXU ...
    h = jnp.dot(feats, w1_ref[...], preferred_element_type=jnp.float32) + b1_ref[...]
    h = jnp.maximum(h, 0.0)                                                 # (TILE_N, mid) f32
    # ... Linear(mid, 1) as VPU multiply + lane reduction (1-wide MXU matmul wastes >99%).
    logits = jnp.sum(h * w2t_ref[...], axis=-1, keepdims=True) + b2_ref[...]  # (TILE_N, 1)
    logits_row = logits.T                                                   # lane-dense (1, TILE_N)
    out2_ref[...] = logits_row                                              # raw pre-sigmoid scores

    # Fused attention + mean pooling as one MXU matvec:
    #   v = (sigmoid(l)^T F + mean(F, 0)) / 2 = sum_n 0.5 * (sigmoid(l_n) + 1/N) * F_n
    valid_row = (row0 + lax.broadcasted_iota(jnp.int32, (1, tile_n), 1)) < n
    w_row = jnp.where(valid_row, 0.5 * (jax.nn.sigmoid(logits_row) + inv_n), 0.0)
    partial_ref[...] += jnp.dot(w_row.astype(feats.dtype), feats,
                                preferred_element_type=jnp.float32)         # (1, D)


def abmil_forward(features, w1, b1, w2, b2, wc, bc, *,
                  tile_n=None, num_slices=2, vmem_stream_budget=8 << 20):
    """MIL head forward. features: (N, D) f32 or bf16. Returns ((1,2) logits, (N,) raw scores)."""
    N, D = features.shape
    mid = w1.shape[1]
    itemsize = jnp.dtype(features.dtype).itemsize

    if tile_n is None:
        tile_n = _choose_tile_n(N, D, itemsize, target_stream_bytes=vmem_stream_budget)
    if tile_n % 128:
        raise ValueError("tile_n must be a multiple of 128 (lane-dense out2 blocks)")

    num_tiles = pl.cdiv(N, tile_n)
    num_slices = max(1, min(num_slices, num_tiles))
    tiles_per_slice = pl.cdiv(num_tiles, num_slices)
    padded_len = num_slices * tiles_per_slice * tile_n   # out2 alloc length (no feature pad!)

    # Stream-dtype matmul operands (bf16 features -> bf16 w1); logits math stays f32.
    w1 = w1.astype(features.dtype)
    b1 = b1.reshape(1, mid).astype(jnp.float32)
    w2t = w2.reshape(1, mid).astype(jnp.float32)     # pre-transposed second attention weight
    b2 = b2.reshape(1, 1).astype(jnp.float32)

    def feat_map(s, t, n_ref):
        idx = s * tiles_per_slice + t
        # Clamp the (at most num_slices-1) duplicated tail tiles; they are fully masked
        # in-kernel and their out2 blocks land in the padded tail, which is sliced off.
        return (jnp.minimum(idx, num_tiles - 1), 0)

    const2 = lambda s, t, n_ref: (0, 0)   # weights stay VMEM-resident across the grid

    kernel = functools.partial(_abmil_kernel, tile_n=tile_n,
                               tiles_per_slice=tiles_per_slice)

    cost = pl.CostEstimate(
        flops=2 * padded_len * D * mid + 4 * padded_len * mid + 2 * padded_len * D,
        transcendentals=padded_len,
        bytes_accessed=N * D * itemsize
        + itemsize * D * mid + 4 * (3 * mid + 1) + 4 * (padded_len + num_slices * D),
    )

    partials, out2_full = pl.pallas_call(
        kernel,
        grid_spec=pltpu.PrefetchScalarGridSpec(
            num_scalar_prefetch=1,                       # bag size N lives in SMEM
            grid=(num_slices, tiles_per_slice),
            in_specs=[
                pl.BlockSpec((tile_n, D), feat_map),     # streamed, double-buffered tiles
                pl.BlockSpec((D, mid), const2),          # attention linear-1 weight (resident)
                pl.BlockSpec((1, mid), const2),          # attention linear-1 bias
                pl.BlockSpec((1, mid), const2),          # attention linear-2 weight (row)
                pl.BlockSpec((1, 1), const2),            # attention linear-2 bias
            ],
            out_specs=(
                # per-slice pooled partial vector; block index constant over t -> accumulator
                pl.BlockSpec((None, 1, D), lambda s, t, n_ref: (s, 0, 0)),
                # lane-dense raw attention scores
                pl.BlockSpec((1, tile_n),
                             lambda s, t, n_ref: (0, s * tiles_per_slice + t)),
            ),
        ),
        out_shape=(
            jax.ShapeDtypeStruct((num_slices, 1, D), jnp.float32),
            jax.ShapeDtypeStruct((1, padded_len), jnp.float32),
        ),
        compiler_params=pltpu.CompilerParams(
            dimension_semantics=("parallel", "arbitrary"),
            vmem_limit_bytes=_vmem_limit_bytes(tile_n, D, mid, itemsize),
        ),
        cost_estimate=cost,
    )(jnp.array([N], dtype=jnp.int32), features, w1, b1, w2t, b2)

    # Tiny epilogue: sum per-slice partials and apply the (1,D)@(D,2) classifier.
    v = jnp.sum(partials, axis=0)                                   # (1, D), f32
    out = v @ wc.astype(jnp.float32) + bc.reshape(1, 2).astype(jnp.float32)
    # PyTorch: out2 = weights.clone().squeeze() -> (N,) raw (pre-sigmoid) scores.
    return out, out2_full[0, :N]


def make_params(key, input_dims):
    mid_dims = input_dims // 2
    k1, k2, k3, k4, k5, k6 = jax.random.split(key, 6)
    s1 = 1.0 / jnp.sqrt(input_dims)
    s2 = 1.0 / jnp.sqrt(mid_dims)
    w1 = jax.random.uniform(k1, (input_dims, mid_dims), jnp.float32, -s1, s1)
    b1 = jax.random.uniform(k2, (1, mid_dims), jnp.float32, -s1, s1)
    w2 = jax.random.uniform(k3, (mid_dims, 1), jnp.float32, -s2, s2)
    b2 = jax.random.uniform(k4, (1, 1), jnp.float32, -s2, s2)
    wc = jax.random.uniform(k5, (input_dims, 2), jnp.float32, -s1, s1)
    bc = jax.random.uniform(k6, (1, 2), jnp.float32, -s1, s1)
    return w1, b1, w2, b2, wc, bc


def reference_forward(features, w1, b1, w2, b2, wc, bc):
    h = jnp.maximum(features @ w1 + b1, 0.0)
    logits = h @ w2 + b2                  # (N, 1)
    logits_t = logits.T                   # (1, N)
    out2 = logits_t.reshape(-1)
    w = jax.nn.sigmoid(logits_t)
    v1 = w @ features
    v2 = jnp.mean(features, axis=0)
    v = (v1 + v2) / 2.0
    return v @ wc + bc, out2


if __name__ == "__main__":
    FC_INPUT_DIMS = 32    # fc_input_dims (encoder feature width)

    key = jax.random.PRNGKey(0)
    k1, k2, k3, kp = jax.random.split(key, 4)
    params = make_params(kp, FC_INPUT_DIMS)

    feats_tiny = jax.random.normal(k1, (8, FC_INPUT_DIMS), jnp.float32)     # single ragged tile
    feats_med = jax.random.normal(k2, (300, FC_INPUT_DIMS), jnp.float32)    # auto tile, ragged edge
    feats_big = jax.random.normal(k3, (600, FC_INPUT_DIMS), jnp.float32)    # multi-tile, 2 slices

    cases = [
        (feats_tiny, {}, 1e-4),
        (feats_med, {}, 1e-4),
        # Force small tiles + 2 slices: exercises streaming, the per-slice accumulator,
        # the clamped duplicate tail tile (5 tiles split 3+3) and ragged-edge masking.
        (feats_big, dict(tile_n=128, num_slices=2), 1e-4),
        # bf16 feature stream (half the HBM bytes); logits/accumulation stay f32.
        (feats_big.astype(jnp.bfloat16), dict(tile_n=128, num_slices=2), 5e-2),
    ]

    for feats, kwargs, tol in cases:
        n = feats.shape[0]
        out, out2 = abmil_forward(feats, *params, **kwargs)
        out, out2 = jax.block_until_ready((out, out2))

        ref_out, ref_out2 = reference_forward(feats.astype(jnp.float32), *params)
        assert out.shape == (1, 2) and out2.shape == (n,)
        assert jnp.allclose(out, ref_out, atol=tol, rtol=tol), (out, ref_out)
        assert jnp.allclose(out2, ref_out2, atol=tol, rtol=tol)

    print("KERNEL_OK")
</pallas_src>

<mosaic_0001>
module attributes {stable_mosaic.version = 11 : i64} {
  func.func @_abmil_kernel(%arg0: i32, %arg1: i32, %arg2: memref<1xi32, #tpu.memory_space<smem>>, %arg3: memref<128x32xf32, #tpu.memory_space<vmem>>, %arg4: memref<32x16xf32, #tpu.memory_space<vmem>>, %arg5: memref<1x16xf32, #tpu.memory_space<vmem>>, %arg6: memref<1x16xf32, #tpu.memory_space<vmem>>, %arg7: memref<1x1xf32, #tpu.memory_space<vmem>>, %arg8: memref<1x1x32xf32, #tpu.memory_space<vmem>>, %arg9: memref<1x128xf32, #tpu.memory_space<vmem>>) attributes {dimension_semantics = [#tpu.dimension_semantics<parallel>, #tpu.dimension_semantics<arbitrary>], iteration_bounds = array<i64: 1, 1>, scalar_prefetch = 1 : i64, scratch_operands = 0 : i64, tpu.core_type = #tpu.core_type<tc>, window_params = [{transform_indices = @transform_0, window_bounds = array<i64: 128, 32>}, {pipeline_mode = #tpu.pipeline_mode<synchronous>, transform_indices = @transform_1, window_bounds = array<i64: 32, 16>}, {pipeline_mode = #tpu.pipeline_mode<synchronous>, transform_indices = @transform_2, window_bounds = array<i64: 1, 16>}, {pipeline_mode = #tpu.pipeline_mode<synchronous>, transform_indices = @transform_3, window_bounds = array<i64: 1, 16>}, {pipeline_mode = #tpu.pipeline_mode<synchronous>, transform_indices = @transform_4, window_bounds = array<i64: 1, 1>}, {transform_indices = @transform_5, window_bounds = array<i64: 1, 1, 32>}, {transform_indices = @transform_6, window_bounds = array<i64: 1, 128>}]} {
    %c0_i32 = arith.constant 0 : i32
    %0 = arith.cmpi eq, %arg1, %c0_i32 : i32
    %1 = arith.extui %0 : i1 to i32
    %c0_i32_0 = arith.constant 0 : i32
    %2 = arith.cmpi ne, %1, %c0_i32_0 : i32
    scf.if %2 {
      %cst_27 = arith.constant 0.000000e+00 : f32
      %60 = vector.broadcast %cst_27 : f32 to vector<1x32xf32>
      %c0_28 = arith.constant 0 : index
      %c0_29 = arith.constant 0 : index
      %c0_30 = arith.constant 0 : index
      %61 = vector.load %arg8[%c0_28, %c0_29, %c0_30] : memref<1x1x32xf32, #tpu.memory_space<vmem>>, vector<1x1x32xf32>
      %62 = vector.shape_cast %61 : vector<1x1x32xf32> to vector<1x32xf32>
      %63 = vector.shape_cast %60 : vector<1x32xf32> to vector<1x1x32xf32>
      tpu.vector_store %arg8[%c0_28, %c0_29, %c0_30], %63 {strides = array<i32>} : memref<1x1x32xf32, #tpu.memory_space<vmem>>, vector<1x1x32xf32>,
    } else {
    }
    %c0 = arith.constant 0 : index
    %3 = memref.load %arg2[%c0] : memref<1xi32, #tpu.memory_space<smem>>
    %4 = arith.sitofp %3 : i32 to f32
    %cst = arith.constant 1.000000e+00 : f32
    %5 = arith.divf %cst, %4 : f32
    %c1_i32 = arith.constant 1 : i32
    %6 = arith.muli %arg0, %c1_i32 : i32
    %7 = arith.addi %6, %arg1 : i32
    %c128_i32 = arith.constant 128 : i32
    %8 = arith.muli %7, %c128_i32 : i32
    %9 = tpu.iota {dimensions = array<i32: 0>} : vector<128x1xi32>
    %10 = vector.broadcast %8 : i32 to vector<128x1xi32>
    %11 = arith.addi %10, %9 : vector<128x1xi32>
    %12 = vector.broadcast %3 : i32 to vector<128x1xi32>
    %13 = arith.cmpi slt, %11, %12 : vector<128x1xi32>
    %c0_1 = arith.constant 0 : index
    %c0_2 = arith.constant 0 : index
    %14 = vector.load %arg3[%c0_1, %c0_2] : memref<128x32xf32, #tpu.memory_space<vmem>>, vector<128x32xf32>
    %c0_i32_3 = arith.constant 0 : i32
    %15 = arith.sitofp %c0_i32_3 : i32 to f32
    %16 = vector.shape_cast %13 : vector<128x1xi1> to vector<128x1xi1>
    %17 = vector.broadcast %16 : vector<128x1xi1> to vector<128x32xi1>
    %18 = vector.broadcast %15 : f32 to vector<128x32xf32>
    %19 = arith.select %17, %14, %18 : vector<128x32xi1>, vector<128x32xf32>
    %c0_4 = arith.constant 0 : index
    %c0_5 = arith.constant 0 : index
    %20 = vector.load %arg4[%c0_4, %c0_5] : memref<32x16xf32, #tpu.memory_space<vmem>>, vector<32x16xf32>
    %cst_6 = arith.constant dense<0.000000e+00> : vector<128x16xf32>
    %21 = tpu.matmul %19, %20, %cst_6 {dimension_numbers = #tpu.dot_dimension_numbers<[1], [0], [0], [1], [0, 0, 1, 1], [], []>} : vector<128x32xf32>, vector<32x16xf32>, vector<128x16xf32> -> vector<128x16xf32>
    %c0_7 = arith.constant 0 : index
    %c0_8 = arith.constant 0 : index
    %22 = vector.load %arg5[%c0_7, %c0_8] : memref<1x16xf32, #tpu.memory_space<vmem>>, vector<1x16xf32>
    %23 = vector.broadcast %22 : vector<1x16xf32> to vector<128x16xf32>
    %24 = arith.addf %21, %23 : vector<128x16xf32>
    %cst_9 = arith.constant 0.000000e+00 : f32
    %25 = vector.broadcast %cst_9 : f32 to vector<128x16xf32>
    %26 = arith.maximumf %24, %25 : vector<128x16xf32>
    %c0_10 = arith.constant 0 : index
    %c0_11 = arith.constant 0 : index
    %27 = vector.load %arg6[%c0_10, %c0_11] : memref<1x16xf32, #tpu.memory_space<vmem>>, vector<1x16xf32>
    %28 = vector.broadcast %27 : vector<1x16xf32> to vector<128x16xf32>
    %29 = arith.mulf %26, %28 : vector<128x16xf32>
    %cst_12 = arith.constant dense<0.000000e+00> : vector<128xf32>
    %30 = vector.multi_reduction <add>, %29, %cst_12 [1] : vector<128x16xf32> to vector<128xf32>
    %31 = vector.shape_cast %30 : vector<128xf32> to vector<128x1xf32>
    %c0_13 = arith.constant 0 : index
    %c0_14 = arith.constant 0 : index
    %32 = vector.load %arg7[%c0_13, %c0_14] : memref<1x1xf32, #tpu.memory_space<vmem>>, vector<1x1xf32>
    %33 = vector.broadcast %32 : vector<1x1xf32> to vector<128x1xf32>
    %34 = arith.addf %31, %33 : vector<128x1xf32>
    %35 = tpu.transpose %34, [1, 0] : vector<128x1xf32> -> vector<1x128xf32>
    %c0_15 = arith.constant 0 : index
    %c0_16 = arith.constant 0 : index
    %36 = vector.load %arg9[%c0_15, %c0_16] : memref<1x128xf32, #tpu.memory_space<vmem>>, vector<1x128xf32>
    tpu.vector_store %arg9[%c0_15, %c0_16], %35 {strides = array<i32>} : memref<1x128xf32, #tpu.memory_space<vmem>>, vector<1x128xf32>,
    %37 = tpu.iota {dimensions = array<i32: 1>} : vector<1x128xi32>
    %38 = vector.broadcast %8 : i32 to vector<1x128xi32>
    %39 = arith.addi %38, %37 : vector<1x128xi32>
    %40 = vector.broadcast %3 : i32 to vector<1x128xi32>
    %41 = arith.cmpi slt, %39, %40 : vector<1x128xi32>
    %42 = arith.negf %35 : vector<1x128xf32>
    %43 = math.exp %42 : vector<1x128xf32>
    %cst_17 = arith.constant 1.000000e+00 : f32
    %44 = vector.broadcast %cst_17 : f32 to vector<1x128xf32>
    %45 = arith.addf %44, %43 : vector<1x128xf32>
    %46 = arith.divf %44, %45 : vector<1x128xf32>
    %47 = vector.broadcast %5 : f32 to vector<1x128xf32>
    %48 = arith.addf %46, %47 : vector<1x128xf32>
    %cst_18 = arith.constant 5.000000e-01 : f32
    %49 = vector.broadcast %cst_18 : f32 to vector<1x128xf32>
    %50 = arith.mulf %49, %48 : vector<1x128xf32>
    %cst_19 = arith.constant 0.000000e+00 : f32
    %51 = vector.broadcast %cst_19 : f32 to vector<1x128xf32>
    %52 = arith.select %41, %50, %51 : vector<1x128xi1>, vector<1x128xf32>
    %c0_20 = arith.constant 0 : index
    %c0_21 = arith.constant 0 : index
    %c0_22 = arith.constant 0 : index
    %53 = vector.load %arg8[%c0_20, %c0_21, %c0_22] : memref<1x1x32xf32, #tpu.memory_space<vmem>>, vector<1x1x32xf32>
    %54 = vector.shape_cast %53 : vector<1x1x32xf32> to vector<1x32xf32>
    %cst_23 = arith.constant dense<0.000000e+00> : vector<1x32xf32>
    %55 = tpu.matmul %52, %19, %cst_23 {dimension_numbers = #tpu.dot_dimension_numbers<[1], [0], [0], [1], [0, 0, 1, 1], [], []>} : vector<1x128xf32>, vector<128x32xf32>, vector<1x32xf32> -> vector<1x32xf32>
    %56 = arith.addf %54, %55 : vector<1x32xf32>
    %c0_24 = arith.constant 0 : index
    %c0_25 = arith.constant 0 : index
    %c0_26 = arith.constant 0 : index
    %57 = vector.load %arg8[%c0_24, %c0_25, %c0_26] : memref<1x1x32xf32, #tpu.memory_space<vmem>>, vector<1x1x32xf32>
    %58 = vector.shape_cast %57 : vector<1x1x32xf32> to vector<1x32xf32>
    %59 = vector.shape_cast %56 : vector<1x32xf32> to vector<1x1x32xf32>
    tpu.vector_store %arg8[%c0_24, %c0_25, %c0_26], %59 {strides = array<i32>} : memref<1x1x32xf32, #tpu.memory_space<vmem>>, vector<1x1x32xf32>,
    return
  }
  func.func @transform_0(%arg0: i32, %arg1: i32, %arg2: memref<1xi32, #tpu.memory_space<smem>>) -> (i32, i32) {
    %c1_i32 = arith.constant 1 : i32
    %0 = arith.muli %arg0, %c1_i32 : i32
    %1 = arith.addi %0, %arg1 : i32
    %c0_i32 = arith.constant 0 : i32
    %2 = arith.minsi %1, %c0_i32 : i32
    %c0_i32_0 = arith.constant 0 : i32
    %c0_i32_1 = arith.constant 0 : i32
    return %2, %c0_i32_0 : i32, i32
  }
  func.func @transform_1(%arg0: i32, %arg1: i32, %arg2: memref<1xi32, #tpu.memory_space<smem>>) -> (i32, i32) {
    %c0_i32 = arith.constant 0 : i32
    %c0_i32_0 = arith.constant 0 : i32
    %c0_i32_1 = arith.constant 0 : i32
    return %c0_i32, %c0_i32_0 : i32, i32
  }
  func.func @transform_2(%arg0: i32, %arg1: i32, %arg2: memref<1xi32, #tpu.memory_space<smem>>) -> (i32, i32) {
    %c0_i32 = arith.constant 0 : i32
    %c0_i32_0 = arith.constant 0 : i32
    %c0_i32_1 = arith.constant 0 : i32
    return %c0_i32, %c0_i32_0 : i32, i32
  }
  func.func @transform_3(%arg0: i32, %arg1: i32, %arg2: memref<1xi32, #tpu.memory_space<smem>>) -> (i32, i32) {
    %c0_i32 = arith.constant 0 : i32
    %c0_i32_0 = arith.constant 0 : i32
    %c0_i32_1 = arith.constant 0 : i32
    return %c0_i32, %c0_i32_0 : i32, i32
  }
  func.func @transform_4(%arg0: i32, %arg1: i32, %arg2: memref<1xi32, #tpu.memory_space<smem>>) -> (i32, i32) {
    %c0_i32 = arith.constant 0 : i32
    %c0_i32_0 = arith.constant 0 : i32
    %c0_i32_1 = arith.constant 0 : i32
    return %c0_i32, %c0_i32_0 : i32, i32
  }
  func.func @transform_5(%arg0: i32, %arg1: i32, %arg2: memref<1xi32, #tpu.memory_space<smem>>) -> (i32, i32, i32) {
    %c0_i32 = arith.constant 0 : i32
    %c0_i32_0 = arith.constant 0 : i32
    %c0_i32_1 = arith.constant 0 : i32
    return %arg0, %c0_i32, %c0_i32_0 : i32, i32, i32
  }
  func.func @transform_6(%arg0: i32, %arg1: i32, %arg2: memref<1xi32, #tpu.memory_space<smem>>) -> (i32, i32) {
    %c1_i32 = arith.constant 1 : i32
    %0 = arith.muli %arg0, %c1_i32 : i32
    %1 = arith.addi %0, %arg1 : i32
    %c0_i32 = arith.constant 0 : i32
    %c0_i32_0 = arith.constant 0 : i32
    return %c0_i32, %1 : i32, i32
  }
}

</mosaic_0001>

<bundles_post_ra>
// kernel: tpu_custom_call.1
= control target key start
LH: loop header
LB: loop body
LE: loop exit
PB: predicated region body
PF: predicated region fallthrough
CT: control target
= control target key end

     0   :  { %s1327_s0 = inlined_call_operand.<no memory space> [shape: s32[1], index: 0, kind: input, shape index: {}]   ;;  %s1328_s1 = inlined_call_operand.vmem [shape: f32[8,32], index: 1, kind: input, shape index: {}]   ;;  %s1329_s2 = inlined_call_operand.vmem [shape: f32[32,16], index: 2, kind: input, shape index: {}]   ;;  %s1330_s3 = inlined_call_operand.vmem [shape: f32[1,16], index: 3, kind: input, shape index: {}]   ;;  %s1331_s4 = inlined_call_operand.vmem [shape: f32[1,16], index: 4, kind: input, shape index: {}]   ;;  %s1332_s5 = inlined_call_operand.<no memory space> [shape: f32[1,1], index: 5, kind: input, shape index: {}]   ;;  %s1333_s6 = inlined_call_operand.hbm [shape: f32[1,1,32], index: 6, kind: output, shape index: {0}]   ;;  %s1334_s7 = inlined_call_operand.hbm [shape: f32[1,128], index: 7, kind: output, shape index: {1}]  }
   0x1   :  { %v14_v0 = vstv %s1332_s5 }
   0x2   :  { %15 = vst [vmem:[#allocation4] sm:$0x1] %v14_v0 }
   0x3   :  { %16 = vsyncpa [#allocation6], 0  ;;  %v202_v1 = vld [vmem:[%s1329_s2 + $0x18] sm:$0xff]  ;;  %v201_v2 = vld [vmem:[%s1329_s2 + $0x10] sm:$0xff]  ;;  %v84_v3 = vlaneseq  ;;  %v926_v4 = vstv %s1327_s0  ;;  %vm210_vm0 = vcmask 261120  }
   0x4   :  { %747 = vmatprep.subr.mxu0 %v202_v1  ;;  %v200_v5 = vld [vmem:[%s1329_s2 + $0x8] sm:$0xff]  ;;  %v937_v7 = vld [vmem:[%s1328_s1] sm:$0xff]  ;;  %v958_v12 = vld [vmem:[%s1328_s1 + $0x10] sm:$0xff] }
   0x5   :  { %748 = vmatpush3.msra.mxu0 %v202_v1  ;;  %v932_v6 = vshrl.u32 %v84_v3, 7  ;;  %v199_v8 = vld [vmem:[%s1329_s2] sm:$0xff]  ;;  %v950_v10 = vld [vmem:[%s1328_s1 + $0x8] sm:$0xff]  ;;  %v988_v18 = vld [vmem:[%s1328_s1 + $0x18] sm:$0xff] }
   0x6   :  { %749 = vmatprep.subr.mxu0 %v201_v2 }
   0x7   :  { %750 = vmatpush3.msra.mxu0 %v201_v2  ;;  %vm1335_vm1 = vcmp.lt.s32.totalorder %v932_v6, %v926_v4  ;;  %v945_v9 = vadd.s32 8, %v932_v6  ;;  %v953_v11 = vadd.s32 16, %v932_v6  ;;  %v961_v13 = vadd.s32 24, %v932_v6 }
   0x8   :  { %751 = vmatprep.subr.mxu0 %v200_v5  ;;  %v183_v14 = vsel %vm1335_vm1, %v937_v7, 0.0  ;;  %v968_v15 = vadd.s32 32, %v932_v6  ;;  %v991_v19 = vadd.s32 40, %v932_v6 }
   0x9   :  { %752 = vmatpush3.msra.mxu0 %v200_v5  ;;  %755 = vmatprep.mubr.msk.f32.mxu0 %vm210_vm0, %v183_v14  ;;  %vm1336_vm2 = vcmp.lt.s32.totalorder %v945_v9, %v926_v4  ;;  %vm121_vm3 = vcmp.lt.s32.totalorder %v953_v11, %v926_v4  ;;  %vm122_vm4 = vcmp.lt.s32.totalorder %v961_v13, %v926_v4 }
   0xa   :  { %753 = vmatprep.subr.mxu0 %v199_v8  ;;  %v184_v16 = vsel %vm1336_vm2, %v950_v10, 0.0  ;;  %v185_v17 = vsel %vm121_vm3, %v958_v12, 0.0 }
   0xb   :  { %17 = vsyncpa [#allocation8], 0  ;;  %754 = vmatpush3.msra.mxu0 %v199_v8  ;;  %vm123_vm5 = vcmp.lt.s32.totalorder %v968_v15, %v926_v4  ;;  %v998_v20 = vld [vmem:[%s1328_s1 + $0x20] sm:$0xff]  ;;  %v1001_v21 = vadd.s32 48, %v932_v6  ;;  %v186_v22 = vsel %vm122_vm4, %v988_v18, 0.0  ;;  %vm124_vm6 = vcmp.lt.s32.totalorder %v991_v19, %v926_v4  ;;  %v1018_v24 = vld [vmem:[%s1328_s1 + $0x28] sm:$0xff]  ;;  %s78_s21 = scvt.s32.f32 %s1327_s0 }
   0xc   :  { %756 = vmatmul.mubr.msk.f32.vlgmr.msra.gmra.mxu0 %vm210_vm0, %v184_v16  ;;  %v187_v23 = vsel %vm123_vm5, %v998_v20, 0.0  ;;  %v1021_v25 = vadd.s32 56, %v932_v6  ;;  %v1028_v26 = vld [vmem:[%s1328_s1 + $0x30] sm:$0xff]  ;;  %v1031_v27 = vadd.s32 64, %v932_v6  ;;  %v188_v28 = vsel %vm124_vm6, %v1018_v24, 0.0  ;;  %v1048_v30 = vld [vmem:[%s1328_s1 + $0x38] sm:$0xff] }
   0xd   :  { %758 = vmatprep.mubr.msk.f32.mxu0 %vm210_vm0, %v185_v17  ;;  %vm125_vm7 = vcmp.lt.s32.totalorder %v1001_v21, %v926_v4  ;;  %v1051_v31 = vadd.s32 72, %v932_v6  ;;  %v1058_v32 = vld [vmem:[%s1328_s1 + $0x40] sm:$0xff]  ;;  %v1061_v33 = vadd.s32 80, %v932_v6  ;;  %v1078_v36 = vld [vmem:[%s1328_s1 + $0x48] sm:$0xff]  ;;  %v1081_v37 = vadd.s32 88, %v932_v6  ;;  %v1088_v38 = vld [vmem:[%s1328_s1 + $0x50] sm:$0xff] }
   0xe   :  { %v189_v29 = vsel %vm125_vm7, %v1028_v26, 0.0  ;;  %vm126_vm8 = vcmp.lt.s32.totalorder %v1021_v25, %v926_v4  ;;  %vm127_vm9 = vcmp.lt.s32.totalorder %v1031_v27, %v926_v4  ;;  %v1091_v39 = vadd.s32 96, %v932_v6  ;;  %v1108_v42 = vld [vmem:[%s1328_s1 + $0x58] sm:$0xff]  ;;  %v1118_v44 = vld [vmem:[%s1328_s1 + $0x60] sm:$0xff]  ;;  %v1138_v48 = vld [vmem:[%s1328_s1 + $0x68] sm:$0xff]  ;;  %s872_s22 = smov [#allocation7]  }
   0xf   :  { %v190_v34 = vsel %vm126_vm8, %v1048_v30, 0.0  ;;  %v191_v35 = vsel %vm127_vm9, %v1058_v32, 0.0  ;;  %vm128_vm10 = vcmp.lt.s32.totalorder %v1051_v31, %v926_v4  ;;  %vm129_vm11 = vcmp.lt.s32.totalorder %v1061_v33, %v926_v4  ;;  %v1148_v50 = vld [vmem:[%s1328_s1 + $0x70] sm:$0xff]  ;;  %v1165_v53 = vld [vmem:[%s1328_s1 + $0x78] sm:$0xff]  ;;  %v1177_v55 = vld [vmem:[%s1330_s3] ss:$0 sm:$0xff] }
  0x10   :  { %759 = vmatmul.mubr.msk.f32.gmra.mxu0 %vm210_vm0, %v186_v22  ;;  %v192_v40 = vsel %vm128_vm10, %v1078_v36, 0.0  ;;  %v193_v41 = vsel %vm129_vm11, %v1088_v38, 0.0  ;;  %vm130_vm12 = vcmp.lt.s32.totalorder %v1081_v37, %v926_v4  ;;  %v1111_v43 = vadd.s32 104, %v932_v6  ;;  %v1183_v59 = vld [vmem:[%s1331_s4] ss:$0 sm:$0xff]  ;;  %s655_s23 = sshll.u32 %s872_s22, 4  ;;  %s656_s23 = int_to_ptr.vmem [resolvable:$true] %s655_s23 }
  0x11   :  { %761 = vmatprep.mubr.msk.f32.mxu0 %vm210_vm0, %v187_v23  ;;  %vm131_vm13 = vcmp.lt.s32.totalorder %v1091_v39, %v926_v4  ;;  %v1121_v45 = vadd.s32 112, %v932_v6  ;;  %v194_v46 = vsel %vm130_vm12, %v1108_v42, 0.0  ;;  %v1141_v49 = vadd.s32 120, %v932_v6  ;;  %s826_s24 = scalar_lea.vmem %s656_s23, 16  ;;  %s830_s25 = scalar_lea.vmem %s656_s23, 32 }
  0x12   :  { %v195_v47 = vsel %vm131_vm13, %v1118_v44, 0.0  ;;  %vm132_vm14 = vcmp.lt.s32.totalorder %v1111_v43, %v926_v4  ;;  %vm443_vm2 = vcmask 130048   ;;  %p827_p0 = scmp.ne.s32.totalorder %s656_s23, %s826_s24  ;;  %p831_p1 = scmp.lt.s32.totalorder %s656_s23, %s656_s23 }
  0x13   :  { %vm133_vm15 = vcmp.lt.s32.totalorder %v1121_v45, %v926_v4  ;;  %v196_v51 = vsel %vm132_vm14, %v1138_v48, 0.0  ;;  %vm134_vm1 = vcmp.lt.s32.totalorder %v1141_v49, %v926_v4  ;;  %p832_p2 = scmp.lt.s32.totalorder %s830_s25, %s826_s24 }
  0x14   :  { %762 = vmatmul.mubr.msk.f32.gmra.mxu0 %vm210_vm0, %v188_v28  ;;  %v197_v52 = vsel %vm133_vm15, %v1148_v50, 0.0  ;;  %v198_v54 = vsel %vm134_vm1, %v1165_v53, 0.0 }
  0x15   :  { %764 = vmatprep.mubr.msk.f32.mxu0 %vm210_vm0, %v189_v29  ;;  %p833_p3 = por %p832_p2, %p831_p1 }
  0x17   :  { %p834_p4 = pnand %p833_p3, %p827_p0 }
  0x18   :  { %765 = vmatmul.mubr.msk.f32.gmra.mxu0 %vm210_vm0, %v190_v34 }
  0x19   :  { %767 = vmatprep.mubr.msk.f32.mxu0 %vm210_vm0, %v191_v35 }
  0x1c   :  { %768 = vmatmul.mubr.msk.f32.gmra.mxu0 %vm210_vm0, %v192_v40 }
  0x1d   :  { %770 = vmatprep.mubr.msk.f32.mxu0 %vm210_vm0, %v193_v41 }
  0x20   :  { %771 = vmatmul.mubr.msk.f32.gmra.mxu0 %vm210_vm0, %v194_v46 }
  0x21   :  { %773 = vmatprep.mubr.msk.f32.mxu0 %vm210_vm0, %v195_v47 }
  0x24   :  { %774 = vmatmul.mubr.msk.f32.gmra.mxu0 %vm210_vm0, %v196_v51 }
  0x25   :  { %776 = vmatprep.mubr.msk.f32.mxu0 %vm210_vm0, %v197_v52 }
  0x28   :  { %777 = vmatmul.mubr.msk.f32.gmra.mxu0 %vm210_vm0, %v198_v54  ;;  %vm1337_vm0 = vcmp.lt.s32.totalorder %v945_v9, %v926_v4 }
  0xcc   :  { %v757_v56 = vpop.f32.mrf.mxu0 }
  0xcd   :  { %v331_v57 = vadd.f32 %v757_v56, %v1177_v55 }
  0xce   :  { %v325_v58 = vpop.f32.mrf.mxu0 }
  0xcf   :  { %v405_v60 = vmax.f32 %v331_v57, 0.0  ;;  %v326_v61 = vadd.f32 %v1177_v55, %v325_v58 }
  0xd0   :  { %v760_v62 = vpop.f32.mrf.mxu0 }
  0xd1   :  { %v404_v63 = vmax.f32 %v326_v61, 0.0  ;;  %v341_v0 = vadd.f32 %v760_v62, %v1177_v55  ;;  %v428_v1 = vmul.f32 %v1183_v59, %v405_v60 }
  0xd2   :  { %v335_v2 = vpop.f32.mrf.mxu0 }
  0xd3   :  { %v407_v5 = vmax.f32 %v341_v0, 0.0  ;;  %v336_v8 = vadd.f32 %v1177_v55, %v335_v2  ;;  %v447_v14 = vsel %vm443_vm2, %v428_v1, 0.0  ;;  %v427_v16 = vmul.f32 %v1183_v59, %v404_v63 }
  0xd4   :  { %448 = vadd.xlane.f32.xlu0 %v447_v14  ;;  %v763_v17 = vpop.f32.mrf.mxu0 }
  0xd5   :  { %v406_v22 = vmax.f32 %v336_v8, 0.0  ;;  %v351_v23 = vadd.f32 %v763_v17, %v1177_v55  ;;  %v430_v29 = vmul.f32 %v1183_v59, %v407_v5  ;;  %v444_v34 = vsel %vm443_vm2, %v427_v16, 0.0 }
  0xd6   :  { %v345_v28 = vpop.f32.mrf.mxu0 }
  0xd7   :  { %v429_v35 = vmul.f32 %v1183_v59, %v406_v22  ;;  %v409_v40 = vmax.f32 %v351_v23, 0.0  ;;  %v346_v41 = vadd.f32 %v1177_v55, %v345_v28  ;;  %v453_v54 = vsel %vm443_vm2, %v430_v29, 0.0 }
  0xd8   :  { %445 = vadd.xlane.f32.xlu0 %v444_v34  ;;  %v766_v46 = vpop.f32.mrf.mxu0 }
  0xd9   :  { %v450_v47 = vsel %vm443_vm2, %v429_v35, 0.0  ;;  %v408_v51 = vmax.f32 %v346_v41, 0.0  ;;  %v361_v52 = vadd.f32 %v766_v46, %v1177_v55  ;;  %v432_v60 = vmul.f32 %v1183_v59, %v409_v40 }
  0xda   :  { %451 = vadd.xlane.f32.xlu1 %v450_v47  ;;  %v355_v56 = vpop.f32.mrf.mxu0 }
  0xdb   :  { %v411_v57 = vmax.f32 %v361_v52, 0.0  ;;  %v356_v58 = vadd.f32 %v1177_v55, %v355_v56  ;;  %v431_v61 = vmul.f32 %v1183_v59, %v408_v51  ;;  %v459_v8 = vsel %vm443_vm2, %v432_v60, 0.0 }
  0xdc   :  { %v769_v62 = vpop.f32.mrf.mxu0 }
  0xdd   :  { %v410_v63 = vmax.f32 %v356_v58, 0.0  ;;  %v456_v0 = vsel %vm443_vm2, %v431_v61, 0.0  ;;  %v371_v1 = vadd.f32 %v769_v62, %v1177_v55  ;;  %v434_v5 = vmul.f32 %v1183_v59, %v411_v57 }
  0xde   :  { %454 = vadd.xlane.f32.xlu1 %v453_v54  ;;  %457 = vadd.xlane.f32.xlu0 %v456_v0  ;;  %v365_v2 = vpop.f32.mrf.mxu0 }
  0xdf   :  { %v413_v14 = vmax.f32 %v371_v1, 0.0  ;;  %v366_v16 = vadd.f32 %v1177_v55, %v365_v2  ;;  %v433_v17 = vmul.f32 %v1183_v59, %v410_v63  ;;  %v465_v34 = vsel %vm443_vm2, %v434_v5, 0.0 }
  0xe0   :  { %v772_v22 = vpop.f32.mrf.mxu0 }
  0xe1   :  { %v412_v23 = vmax.f32 %v366_v16, 0.0  ;;  %v462_v28 = vsel %vm443_vm2, %v433_v17, 0.0  ;;  %v381_v29 = vadd.f32 %v772_v22, %v1177_v55  ;;  %v436_v46 = vmul.f32 %v1183_v59, %v413_v14 }
  0xe2   :  { %460 = vadd.xlane.f32.xlu1 %v459_v8  ;;  %463 = vadd.xlane.f32.xlu0 %v462_v28  ;;  %v375_v35 = vpop.f32.mrf.mxu0 }
  0xe3   :  { %v415_v40 = vmax.f32 %v381_v29, 0.0  ;;  %v376_v41 = vadd.f32 %v1177_v55, %v375_v35  ;;  %v435_v47 = vmul.f32 %v1183_v59, %v412_v23  ;;  %v471_v60 = vsel %vm443_vm2, %v436_v46, 0.0 }
  0xe4   :  { %v775_v51 = vpop.f32.mrf.mxu0  ;;  %v79_v46 = vstv %s78_s21 }
  0xe5   :  { %v414_v52 = vmax.f32 %v376_v41, 0.0  ;;  %v468_v54 = vsel %vm443_vm2, %v435_v47, 0.0  ;;  %v391_v56 = vadd.f32 %v775_v51, %v1177_v55  ;;  %v438_v58 = vmul.f32 %v1183_v59, %v415_v40 }
  0xe6   :  { %466 = vadd.xlane.f32.xlu1 %v465_v34  ;;  %469 = vadd.xlane.f32.xlu0 %v468_v54  ;;  %v385_v57 = vpop.f32.mrf.mxu0  ;;  %820 = vrcp.f32 %v79_v46 }
  0xe7   :  { %v417_v61 = vmax.f32 %v391_v56, 0.0  ;;  %v386_v62 = vadd.f32 %v1177_v55, %v385_v57  ;;  %v437_v63 = vmul.f32 %v1183_v59, %v414_v52  ;;  %v477_v8 = vsel %vm443_vm2, %v438_v58, 0.0  ;;  %v1235_v52 = vld [vmem:[#allocation4] ss:$0 sm:$0xff] }
  0xe8   :  { %v778_v0 = vpop.f32.mrf.mxu0  ;;  %v870_v57 = vmov 0.0  }
  0xe9   :  { %v416_v1 = vmax.f32 %v386_v62, 0.0  ;;  %v474_v2 = vsel %vm443_vm2, %v437_v63, 0.0  ;;  %v401_v5 = vadd.f32 %v778_v0, %v1177_v55  ;;  %v440_v22 = vmul.f32 %v1183_v59, %v417_v61  ;;  %779 = vmatprep.subr.mxu1 %v870_v57 }
  0xea   :  { %472 = vadd.xlane.f32.xlu1 %v471_v60  ;;  %475 = vadd.xlane.f32.xlu0 %v474_v2  ;;  %v395_v14 = vpop.f32.mrf.mxu0 }
  0xeb   :  { %v419_v16 = vmax.f32 %v401_v5, 0.0  ;;  %v396_v17 = vadd.f32 %v1177_v55, %v395_v14  ;;  %v439_v23 = vmul.f32 %v1183_v59, %v416_v1  ;;  %v483_v34 = vsel %vm443_vm2, %v440_v22, 0.0  ;;  %780 = vmatpush3.msk.msra.mxu1 %vm134_vm1, %v1165_v53 }
  0xec   :  { %781 = vmatprep.subr.mxu1 %v870_v57  ;;  %vm1338_vm1 = vcmp.lt.s32.totalorder %v932_v6, %v926_v4 }
  0xed   :  { %v418_v28 = vmax.f32 %v396_v17, 0.0  ;;  %v480_v29 = vsel %vm443_vm2, %v439_v23, 0.0  ;;  %v442_v35 = vmul.f32 %v1183_v59, %v419_v16  ;;  %782 = vmatpush3.msk.msra.mxu1 %vm133_vm15, %v1148_v50  ;;  %v549_v50 = vand.u32 127, %v84_v3 }
  0xee   :  { %478 = vadd.xlane.f32.xlu1 %v477_v8  ;;  %481 = vadd.xlane.f32.xlu0 %v480_v29 }
  0xef   :  { %v441_v40 = vmul.f32 %v1183_v59, %v418_v28  ;;  %v489_v55 = vsel %vm443_vm2, %v442_v35, 0.0  ;;  %783 = vmatprep.subr.mxu1 %v870_v57 }
  0xf0   :  { %784 = vmatpush3.msk.msra.mxu1 %vm132_vm14, %v1138_v48 }
  0xf1   :  { %v486_v41 = vsel %vm443_vm2, %v441_v40, 0.0  ;;  %785 = vmatprep.subr.mxu1 %v870_v57  ;;  %vm871_vm2 = vmmov 0  }
  0xf2   :  { %484 = vadd.xlane.f32.xlu1 %v483_v34  ;;  %487 = vadd.xlane.f32.xlu0 %v486_v41 }
  0xf3   :  { %v821_v47 = vpop.eup %820  ;;  %786 = vmatpush3.msk.msra.mxu1 %vm131_vm13, %v1118_v44  ;;  %811 = vmatprep.mubr.msk.f32.mxu1 %vm871_vm2, %v870_v57 }
  0xf4   :  { %814 = vpush %v821_v47  ;;  %787 = vmatprep.subr.mxu1 %v870_v57 }
  0xf5   :  { %788 = vmatpush3.msk.msra.mxu1 %vm130_vm12, %v1108_v42 }
  0xf6   :  { %490 = vadd.xlane.f32.xlu1 %v489_v55  ;;  %789 = vmatprep.subr.mxu1 %v870_v57 }
  0xf7   :  { %790 = vmatpush3.msk.msra.mxu1 %vm129_vm11, %v1088_v38 }
  0xf8   :  { %791 = vmatprep.subr.mxu1 %v870_v57 }
  0xf9   :  { %792 = vmatpush3.msk.msra.mxu1 %vm128_vm10, %v1078_v36 }
  0xfa   :  { %793 = vmatprep.subr.mxu1 %v870_v57 }
  0xfb   :  { %794 = vmatpush3.msk.msra.mxu1 %vm127_vm9, %v1058_v32 }
  0xfc   :  { %795 = vmatprep.subr.mxu1 %v870_v57 }
  0xfd   :  { %796 = vmatpush3.msk.msra.mxu1 %vm126_vm8, %v1048_v30 }
  0xfe   :  { %797 = vmatprep.subr.mxu1 %v870_v57 }
  0xff   :  { %798 = vmatpush3.msk.msra.mxu1 %vm125_vm7, %v1028_v26 }
 0x100   :  { %799 = vmatprep.subr.mxu1 %v870_v57 }
 0x101   :  { %800 = vmatpush3.msk.msra.mxu1 %vm124_vm6, %v1018_v24 }
 0x102   :  { %801 = vmatprep.subr.mxu1 %v870_v57 }
 0x103   :  { %802 = vmatpush3.msk.msra.mxu1 %vm123_vm5, %v998_v20 }
 0x104   :  { %803 = vmatprep.subr.mxu1 %v870_v57 }
 0x105   :  { %804 = vmatpush3.msk.msra.mxu1 %vm122_vm4, %v988_v18  ;;  %vm75_vm4 = vcmask 253952  }
 0x106   :  { %805 = vmatprep.subr.mxu1 %v870_v57  ;;  %76 = vst.msk [vmem:[#allocation5] sm:$0x1] %vm75_vm4, %v870_v57 }
 0x107   :  { %806 = vmatpush3.msk.msra.mxu1 %vm121_vm3, %v958_v12  ;;  %vm551_vm3 = vcmp.lt.s32.totalorder %v549_v50, %v926_v4 }
 0x108   :  { %807 = vmatprep.subr.mxu1 %v870_v57 }
 0x109   :  { %808 = vmatpush3.msk.msra.mxu1 %vm1337_vm0, %v950_v10 }
 0x10a   :  { %809 = vmatprep.subr.mxu1 %v870_v57 }
 0x10b   :  { %810 = vmatpush3.msk.msra.mxu1 %vm1338_vm1, %v937_v7 }
 0x125   :  { %s815_s0 = spop %814 }
 0x126   :  { %v558_v48 = vstv %s815_s0 }
 0x15d   :  { %v449_v51 = vpop.xlane.xlu0 %448 }
 0x15e   :  { %v500_v58 = vadd.f32 %v1235_v52, %v449_v51 }
 0x161   :  { %v446_v54 = vpop.xlane.xlu0 %445 }
 0x162   :  { %v499_v59 = vadd.f32 %v1235_v52, %v446_v54 }
 0x163   :  { %v452_v56 = vpop.xlane.xlu1 %451 }
 0x164   :  { %515 = vxpose.xlu0.b32.start [1/16] (narrow) %v499_v59, 8  ;;  %v501_v60 = vadd.f32 %v1235_v52, %v452_v56 }
 0x167   :  { %v455_v61 = vpop.xlane.xlu1 %454  ;;  %v458_v49 = vpop.xlane.xlu0 %457 }
 0x168   :  { %516 = vxpose.xlu0.b32.cont [2/16] (narrow) %v500_v58, 8  ;;  %v502_v45 = vadd.f32 %v1235_v52, %v455_v61  ;;  %v503_v39 = vadd.f32 %v1235_v52, %v458_v49 }
 0x16b   :  { %v461_v43 = vpop.xlane.xlu1 %460  ;;  %v464_v37 = vpop.xlane.xlu0 %463 }
 0x16c   :  { %517 = vxpose.xlu0.b32.cont [3/16] (narrow) %v501_v60, 8  ;;  %v504_v33 = vadd.f32 %v1235_v52, %v461_v43  ;;  %v505_v27 = vadd.f32 %v1235_v52, %v464_v37 }
 0x16f   :  { %v467_v31 = vpop.xlane.xlu1 %466  ;;  %v470_v25 = vpop.xlane.xlu0 %469 }
 0x170   :  { %518 = vxpose.xlu0.b32.cont [4/16] (narrow) %v502_v45, 8  ;;  %v506_v21 = vadd.f32 %v1235_v52, %v467_v31  ;;  %v507_v15 = vadd.f32 %v1235_v52, %v470_v25 }
 0x173   :  { %v473_v19 = vpop.xlane.xlu1 %472  ;;  %v476_v12 = vpop.xlane.xlu0 %475 }
 0x174   :  { %519 = vxpose.xlu0.b32.cont [5/16] (narrow) %v503_v39, 8  ;;  %v508_v11 = vadd.f32 %v1235_v52, %v473_v19  ;;  %v509_v9 = vadd.f32 %v1235_v52, %v476_v12 }
 0x177   :  { %v479_v10 = vpop.xlane.xlu1 %478  ;;  %v482_v18 = vpop.xlane.xlu0 %481 }
 0x178   :  { %520 = vxpose.xlu0.b32.cont [6/16] (narrow) %v504_v33, 8  ;;  %v510_v13 = vadd.f32 %v1235_v52, %v479_v10  ;;  %v511_v6 = vadd.f32 %v1235_v52, %v482_v18 }
 0x17b   :  { %v485_v7 = vpop.xlane.xlu1 %484  ;;  %v488_v24 = vpop.xlane.xlu0 %487 }
 0x17c   :  { %521 = vxpose.xlu0.b32.cont [7/16] (narrow) %v505_v27, 8  ;;  %v512_v20 = vadd.f32 %v1235_v52, %v485_v7  ;;  %v513_v26 = vadd.f32 %v1235_v52, %v488_v24 }
 0x17f   :  { %v491_v30 = vpop.xlane.xlu1 %490 }
 0x180   :  { %522 = vxpose.xlu0.b32.cont [8/16] (narrow) %v506_v21, 8  ;;  %v514_v32 = vadd.f32 %v1235_v52, %v491_v30 }
 0x184   :  { %523 = vxpose.xlu0.b32.cont [9/16] (narrow) %v507_v15, 8 }
 0x188   :  { %524 = vxpose.xlu0.b32.cont [10/16] (narrow) %v508_v11, 8 }
 0x18c   :  { %525 = vxpose.xlu0.b32.cont [11/16] (narrow) %v509_v9, 8 }
 0x190   :  { %526 = vxpose.xlu0.b32.cont [12/16] (narrow) %v510_v13, 8 }
 0x194   :  { %527 = vxpose.xlu0.b32.cont [13/16] (narrow) %v511_v6, 8 }
 0x198   :  { %528 = vxpose.xlu0.b32.cont [14/16] (narrow) %v512_v20, 8 }
 0x19c   :  { %529 = vxpose.xlu0.b32.cont [15/16] (narrow) %v513_v26, 8 }
 0x1a0   :  { %530 = vxpose.xlu0.b32.end [16/16] (narrow) %v514_v32, 8 }
 0x1e0   :  { %v531_v36 = vpop.trf.xlu0 }
 0x1e1   :  { %547 = vst [vmem:[#allocation7] sm:$0x1] %v531_v36  ;;  %v692_v38 = vmul.f32 -1.442695, %v531_v36 }
 0x1e3   :  { %822 = vpow2.f32 %v692_v38 }
 0x1f0   :  { %v823_v42 = vpop.eup %822 }
 0x1f1   :  { %v555_v44 = vadd.f32 1.0, %v823_v42 }
 0x1f3   :  { %824 = vrcp.f32 %v555_v44 }
 0x200   :  { %v825_v53 = vpop.eup %824 }
 0x201   :  { %v559_v62 = vadd.f32 %v825_v53, %v558_v48 }
 0x203   :  { %v560_v63 = vmul.f32 0.5, %v559_v62 }
 0x205   :  { %812 = vmatmul.mubr.msk.f32.vlgmr.msra.gmra.mxu1 %vm551_vm3, %v560_v63 }
 0x206   :  { %837 = shalt.err (!%p834_p4)
}
 0x207   :  { %658 = dma.vmem_to_hbm [thread:$0]  %s656_s23, 16, %s1334_s7, [#allocation8]   ;;  %v562_v3 = vld [vmem:[#allocation5] sm:$0x1] }
 0x208   :  { %s873_s28 = smov [#allocation5]  }
 0x209   :  { %s642_s29 = sshll.u32 %s873_s28, 4  ;;  %s643_s29 = int_to_ptr.vmem [resolvable:$true] %s642_s29 }
 0x20a   :  { %s846_s30 = scalar_lea.vmem %s643_s29, 16  ;;  %s850_s8 = scalar_lea.vmem %s643_s29, 32 }
 0x20b   :  { %p847_p5 = scmp.ne.s32.totalorder %s643_s29, %s846_s30  ;;  %p851_p6 = scmp.lt.s32.totalorder %s643_s29, %s643_s29 }
 0x20c   :  { %p852_p7 = scmp.lt.s32.totalorder %s850_s8, %s846_s30 }
 0x20e   :  { %p853_p8 = por %p852_p7, %p851_p6 }
 0x210   :  { %p854_p9 = pnand %p853_p8, %p847_p5 }
 0x2c5   :  { %v629_v4 = vpop.f32.mrf.mxu1 }
 0x2c6   :  { %v633_v0 = vadd.f32 %v629_v4, %v562_v3 }
 0x2c7   :  { %v813_v1 = vpop.f32.mrf.mxu1 }
 0x2c8   :  { %635 = vst.msk [vmem:[#allocation5] sm:$0x1] %vm75_vm4, %v633_v0 }
 0x2c9   :  { %857 = shalt.err (!%p854_p9)
}
 0x2ca   :  { %645 = dma.vmem_to_hbm [thread:$0]  %s643_s29, 16, %s1333_s6, [#allocation6]  }
 0x2cb   :  { %866 = dma.done.wait [#allocation6], 16  }
 0x2cc   :  { %867 = vsyncadd [#allocation6], 4294967280 }
 0x2cd   :  { %868 = dma.done.wait [#allocation8], 16  }
 0x2ce   :  { %869 = vsyncadd [#allocation8], 4294967280 }
 0x2cf   :  { %665 = vsyncpa [#allocation6], 1 }
 0x2d0   :  { %666 = vsyncpa [#allocation8], 1 }

</bundles_post_ra>
